<compile_context>
chip_gen: v6e
topology: v6e:2x2x1
jax: 0.10.0
libtpu: 0.0.40
codegen_flags: <defaults>
</compile_context>

<pallas_src>
import functools

import jax
import jax.numpy as jnp
from jax.experimental import pallas as pl
from jax.experimental.pallas import tpu as pltpu

LANE = 128      # vreg lane width
SUBLANE = 8     # vreg sublane count (f32)


def _round_up(x, m):
    return (x + m - 1) // m * m


def ffn_kernel(x_ref, w1_ref, w2_ref, w3_ref, w4_ref, b_ref, o_ref, *, h_pad, o_pad):
    """Fused 4-layer MLP on one (tm, in_pad) batch tile. Weights already [in, out], padded."""
    compute_dtype = w1_ref.dtype
    x = x_ref[...].astype(compute_dtype)
    b = b_ref[...].astype(jnp.float32)          # (4, P) packed biases, add in f32

    def sigmoid(v):
        # EUP-friendly sigmoid: one tanh push instead of exp + full-precision divide.
        return 0.5 * (jnp.tanh(0.5 * v) + 1.0)

    h = jnp.dot(x, w1_ref[...], preferred_element_type=jnp.float32) + b[0, :h_pad]
    h = sigmoid(h)
    h = jnp.dot(h.astype(compute_dtype), w2_ref[...],
                preferred_element_type=jnp.float32) + b[1, :h_pad]
    h = sigmoid(h)
    h = jnp.dot(h.astype(compute_dtype), w3_ref[...],
                preferred_element_type=jnp.float32) + b[2, :h_pad]
    h = sigmoid(h)
    y = jnp.dot(h.astype(compute_dtype), w4_ref[...],
                preferred_element_type=jnp.float32) + b[3, :o_pad]

    o_ref[...] = y.astype(o_ref.dtype)


def prepare_params(params, compute_dtype=jnp.float32):
    """One-time param prep (do NOT call per forward pass):
    transpose nn.Linear weights to [in, out], zero-pad feature dims to 128 lanes,
    pack the four biases into a single (4, P) f32 array, cast weights to compute_dtype."""
    in_dim = params["w1"].shape[1]
    hidden = params["w1"].shape[0]
    out_dim = params["w4"].shape[0]
    in_pad = _round_up(in_dim, LANE)
    h_pad = _round_up(hidden, LANE)
    o_pad = _round_up(out_dim, LANE)
    p_pad = max(h_pad, o_pad)

    def pad_w(w, rows, cols):
        wt = jnp.asarray(w, jnp.float32).T                       # [in, out]
        wt = jnp.pad(wt, ((0, rows - wt.shape[0]), (0, cols - wt.shape[1])))
        return wt.astype(compute_dtype)

    prepped = {
        "w1": pad_w(params["w1"], in_pad, h_pad),
        "w2": pad_w(params["w2"], h_pad, h_pad),
        "w3": pad_w(params["w3"], h_pad, h_pad),
        "w4": pad_w(params["w4"], h_pad, o_pad),
        "b": jnp.stack(
            [jnp.pad(jnp.asarray(params[f"b{i}"], jnp.float32),
                     (0, p_pad - params[f"b{i}"].shape[0]))
             for i in (1, 2, 3, 4)], axis=0),                    # (4, p_pad), f32
    }
    dims = {"in_dim": in_dim, "hidden": hidden, "out_dim": out_dim,
            "in_pad": in_pad, "h_pad": h_pad, "o_pad": o_pad}
    return prepped, dims


@functools.partial(jax.jit, static_argnames=("out_dim", "block_m"))
def feed_forward_net(x, prepped, *, out_dim, block_m=128):
    """x: [batch, input_size] (f32). prepped: output of prepare_params."""
    batch, in_dim = x.shape
    w1, w2, w3, w4, b = (prepped["w1"], prepped["w2"], prepped["w3"],
                         prepped["w4"], prepped["b"])
    in_pad, h_pad = w1.shape
    o_pad = w4.shape[1]
    p_pad = b.shape[1]

    # Batch tile: at least 8 sublanes, capped at block_m; pad batch up to a multiple.
    tm = min(block_m, _round_up(batch, SUBLANE))
    batch_pad = _round_up(batch, tm)

    # Only per-call prep left: pad x to the tile grid / 128 lanes and cast to compute dtype.
    x_p = jnp.pad(x, ((0, batch_pad - batch), (0, in_pad - in_dim))).astype(w1.dtype)

    kernel = functools.partial(ffn_kernel, h_pad=h_pad, o_pad=o_pad)

    out = pl.pallas_call(
        kernel,
        out_shape=jax.ShapeDtypeStruct((batch_pad, o_pad), x.dtype),
        grid_spec=pltpu.PrefetchScalarGridSpec(
            num_scalar_prefetch=0,
            grid=(batch_pad // tm,),
            in_specs=[
                pl.BlockSpec((tm, in_pad), lambda i: (i, 0)),      # x tile (pipelined)
                pl.BlockSpec((in_pad, h_pad), lambda i: (0, 0)),   # weights: VMEM-resident
                pl.BlockSpec((h_pad, h_pad), lambda i: (0, 0)),
                pl.BlockSpec((h_pad, h_pad), lambda i: (0, 0)),
                pl.BlockSpec((h_pad, o_pad), lambda i: (0, 0)),
                pl.BlockSpec((4, p_pad), lambda i: (0, 0)),        # packed biases
            ],
            out_specs=pl.BlockSpec((tm, o_pad), lambda i: (i, 0)),
        ),
        compiler_params=pltpu.CompilerParams(
            dimension_semantics=("parallel",),   # lights up both TCs on v7x
        ),
    )(x_p, w1, w2, w3, w4, b)

    return out[:batch, :out_dim]


def init_params(key, input_size, hidden_size, output_dim):
    """Deterministic init mimicking nn.Linear's U(-1/sqrt(fan_in), 1/sqrt(fan_in))."""
    dims = [(hidden_size, input_size),
            (hidden_size, hidden_size),
            (hidden_size, hidden_size),
            (output_dim, hidden_size)]
    params = {}
    for i, (out_f, in_f) in enumerate(dims, start=1):
        key, kw, kb = jax.random.split(key, 3)
        bound = 1.0 / jnp.sqrt(in_f)
        params[f"w{i}"] = jax.random.uniform(kw, (out_f, in_f), jnp.float32, -bound, bound)
        params[f"b{i}"] = jax.random.uniform(kb, (out_f,), jnp.float32, -bound, bound)
    return params


def reference_forward(x, params):
    h = x
    for i in (1, 2, 3):
        h = jax.nn.sigmoid(h @ params[f"w{i}"].T + params[f"b{i}"])
    return h @ params["w4"].T + params["b4"]


if __name__ == "__main__":
    batch, input_size, hidden_size, output_dim = 8, 16, 32, 8

    key = jax.random.PRNGKey(0)
    key, kx = jax.random.split(key)
    x = jax.random.normal(kx, (batch, input_size), jnp.float32)
    params = init_params(key, input_size, hidden_size, output_dim)

    ref = reference_forward(x, params)

    # f32 compute path (bit-faithful to the original module semantics)
    prepped_f32, _ = prepare_params(params, compute_dtype=jnp.float32)
    out_f32 = jax.block_until_ready(feed_forward_net(x, prepped_f32, out_dim=output_dim))
    assert out_f32.shape == (batch, output_dim)
    assert jnp.allclose(out_f32, ref, atol=1e-4, rtol=1e-4), "f32 mismatch vs reference"

    # bf16 weight/activation path (f32 MXU accumulation) — the perf-recommended config
    prepped_bf16, _ = prepare_params(params, compute_dtype=jnp.bfloat16)
    out_bf16 = jax.block_until_ready(feed_forward_net(x, prepped_bf16, out_dim=output_dim))
    assert out_bf16.shape == (batch, output_dim)
    assert jnp.allclose(out_bf16, ref, atol=1e-1, rtol=1e-1), "bf16 mismatch vs reference"

    print("KERNEL_OK")
</pallas_src>

<mosaic_0001>
module attributes {stable_mosaic.version = 11 : i64} {
  func.func @ffn_kernel(%arg0: i32, %arg1: memref<8x128xf32, #tpu.memory_space<vmem>>, %arg2: memref<128x128xf32, #tpu.memory_space<vmem>>, %arg3: memref<128x128xf32, #tpu.memory_space<vmem>>, %arg4: memref<128x128xf32, #tpu.memory_space<vmem>>, %arg5: memref<128x128xf32, #tpu.memory_space<vmem>>, %arg6: memref<4x128xf32, #tpu.memory_space<vmem>>, %arg7: memref<8x128xf32, #tpu.memory_space<vmem>>) attributes {dimension_semantics = [#tpu.dimension_semantics<parallel>], iteration_bounds = array<i64: 1>, scalar_prefetch = 0 : i64, scratch_operands = 0 : i64, tpu.core_type = #tpu.core_type<tc>, window_params = [{transform_indices = @transform_0, window_bounds = array<i64: 8, 128>}, {pipeline_mode = #tpu.pipeline_mode<synchronous>, transform_indices = @transform_1, window_bounds = array<i64: 128, 128>}, {pipeline_mode = #tpu.pipeline_mode<synchronous>, transform_indices = @transform_2, window_bounds = array<i64: 128, 128>}, {pipeline_mode = #tpu.pipeline_mode<synchronous>, transform_indices = @transform_3, window_bounds = array<i64: 128, 128>}, {pipeline_mode = #tpu.pipeline_mode<synchronous>, transform_indices = @transform_4, window_bounds = array<i64: 128, 128>}, {pipeline_mode = #tpu.pipeline_mode<synchronous>, transform_indices = @transform_5, window_bounds = array<i64: 4, 128>}, {transform_indices = @transform_6, window_bounds = array<i64: 8, 128>}]} {
    %c0 = arith.constant 0 : index
    %c0_0 = arith.constant 0 : index
    %0 = vector.load %arg1[%c0, %c0_0] : memref<8x128xf32, #tpu.memory_space<vmem>>, vector<8x128xf32>
    %c0_1 = arith.constant 0 : index
    %c0_2 = arith.constant 0 : index
    %1 = vector.load %arg6[%c0_1, %c0_2] : memref<4x128xf32, #tpu.memory_space<vmem>>, vector<4x128xf32>
    %c0_3 = arith.constant 0 : index
    %c0_4 = arith.constant 0 : index
    %2 = vector.load %arg2[%c0_3, %c0_4] : memref<128x128xf32, #tpu.memory_space<vmem>>, vector<128x128xf32>
    %cst = arith.constant dense<0.000000e+00> : vector<8x128xf32>
    %3 = tpu.matmul %0, %2, %cst {dimension_numbers = #tpu.dot_dimension_numbers<[1], [0], [0], [1], [0, 0, 1, 1], [], []>} : vector<8x128xf32>, vector<128x128xf32>, vector<8x128xf32> -> vector<8x128xf32>
    %4 = vector.extract_strided_slice %1 {offsets = [0, 0], sizes = [1, 128], strides = [1, 1]} : vector<4x128xf32> to vector<1x128xf32>
    %5 = vector.shape_cast %4 : vector<1x128xf32> to vector<128xf32>
    %6 = vector.shape_cast %5 : vector<128xf32> to vector<1x128xf32>
    %7 = vector.broadcast %6 : vector<1x128xf32> to vector<8x128xf32>
    %8 = arith.addf %3, %7 : vector<8x128xf32>
    %cst_5 = arith.constant 5.000000e-01 : f32
    %9 = vector.broadcast %cst_5 : f32 to vector<8x128xf32>
    %10 = arith.mulf %9, %8 : vector<8x128xf32>
    %11 = math.tanh %10 : vector<8x128xf32>
    %cst_6 = arith.constant 1.000000e+00 : f32
    %12 = vector.broadcast %cst_6 : f32 to vector<8x128xf32>
    %13 = arith.addf %11, %12 : vector<8x128xf32>
    %cst_7 = arith.constant 5.000000e-01 : f32
    %14 = vector.broadcast %cst_7 : f32 to vector<8x128xf32>
    %15 = arith.mulf %14, %13 : vector<8x128xf32>
    %c0_8 = arith.constant 0 : index
    %c0_9 = arith.constant 0 : index
    %16 = vector.load %arg3[%c0_8, %c0_9] : memref<128x128xf32, #tpu.memory_space<vmem>>, vector<128x128xf32>
    %cst_10 = arith.constant dense<0.000000e+00> : vector<8x128xf32>
    %17 = tpu.matmul %15, %16, %cst_10 {dimension_numbers = #tpu.dot_dimension_numbers<[1], [0], [0], [1], [0, 0, 1, 1], [], []>} : vector<8x128xf32>, vector<128x128xf32>, vector<8x128xf32> -> vector<8x128xf32>
    %18 = vector.extract_strided_slice %1 {offsets = [1, 0], sizes = [1, 128], strides = [1, 1]} : vector<4x128xf32> to vector<1x128xf32>
    %19 = vector.shape_cast %18 : vector<1x128xf32> to vector<128xf32>
    %20 = vector.shape_cast %19 : vector<128xf32> to vector<1x128xf32>
    %21 = vector.broadcast %20 : vector<1x128xf32> to vector<8x128xf32>
    %22 = arith.addf %17, %21 : vector<8x128xf32>
    %cst_11 = arith.constant 5.000000e-01 : f32
    %23 = vector.broadcast %cst_11 : f32 to vector<8x128xf32>
    %24 = arith.mulf %23, %22 : vector<8x128xf32>
    %25 = math.tanh %24 : vector<8x128xf32>
    %cst_12 = arith.constant 1.000000e+00 : f32
    %26 = vector.broadcast %cst_12 : f32 to vector<8x128xf32>
    %27 = arith.addf %25, %26 : vector<8x128xf32>
    %cst_13 = arith.constant 5.000000e-01 : f32
    %28 = vector.broadcast %cst_13 : f32 to vector<8x128xf32>
    %29 = arith.mulf %28, %27 : vector<8x128xf32>
    %c0_14 = arith.constant 0 : index
    %c0_15 = arith.constant 0 : index
    %30 = vector.load %arg4[%c0_14, %c0_15] : memref<128x128xf32, #tpu.memory_space<vmem>>, vector<128x128xf32>
    %cst_16 = arith.constant dense<0.000000e+00> : vector<8x128xf32>
    %31 = tpu.matmul %29, %30, %cst_16 {dimension_numbers = #tpu.dot_dimension_numbers<[1], [0], [0], [1], [0, 0, 1, 1], [], []>} : vector<8x128xf32>, vector<128x128xf32>, vector<8x128xf32> -> vector<8x128xf32>
    %32 = vector.extract_strided_slice %1 {offsets = [2, 0], sizes = [1, 128], strides = [1, 1]} : vector<4x128xf32> to vector<1x128xf32>
    %33 = vector.shape_cast %32 : vector<1x128xf32> to vector<128xf32>
    %34 = vector.shape_cast %33 : vector<128xf32> to vector<1x128xf32>
    %35 = vector.broadcast %34 : vector<1x128xf32> to vector<8x128xf32>
    %36 = arith.addf %31, %35 : vector<8x128xf32>
    %cst_17 = arith.constant 5.000000e-01 : f32
    %37 = vector.broadcast %cst_17 : f32 to vector<8x128xf32>
    %38 = arith.mulf %37, %36 : vector<8x128xf32>
    %39 = math.tanh %38 : vector<8x128xf32>
    %cst_18 = arith.constant 1.000000e+00 : f32
    %40 = vector.broadcast %cst_18 : f32 to vector<8x128xf32>
    %41 = arith.addf %39, %40 : vector<8x128xf32>
    %cst_19 = arith.constant 5.000000e-01 : f32
    %42 = vector.broadcast %cst_19 : f32 to vector<8x128xf32>
    %43 = arith.mulf %42, %41 : vector<8x128xf32>
    %c0_20 = arith.constant 0 : index
    %c0_21 = arith.constant 0 : index
    %44 = vector.load %arg5[%c0_20, %c0_21] : memref<128x128xf32, #tpu.memory_space<vmem>>, vector<128x128xf32>
    %cst_22 = arith.constant dense<0.000000e+00> : vector<8x128xf32>
    %45 = tpu.matmul %43, %44, %cst_22 {dimension_numbers = #tpu.dot_dimension_numbers<[1], [0], [0], [1], [0, 0, 1, 1], [], []>} : vector<8x128xf32>, vector<128x128xf32>, vector<8x128xf32> -> vector<8x128xf32>
    %46 = vector.extract_strided_slice %1 {offsets = [3, 0], sizes = [1, 128], strides = [1, 1]} : vector<4x128xf32> to vector<1x128xf32>
    %47 = vector.shape_cast %46 : vector<1x128xf32> to vector<128xf32>
    %48 = vector.shape_cast %47 : vector<128xf32> to vector<1x128xf32>
    %49 = vector.broadcast %48 : vector<1x128xf32> to vector<8x128xf32>
    %50 = arith.addf %45, %49 : vector<8x128xf32>
    %c0_23 = arith.constant 0 : index
    %c0_24 = arith.constant 0 : index
    %51 = vector.load %arg7[%c0_23, %c0_24] : memref<8x128xf32, #tpu.memory_space<vmem>>, vector<8x128xf32>
    tpu.vector_store %arg7[%c0_23, %c0_24], %50 {strides = array<i32>} : memref<8x128xf32, #tpu.memory_space<vmem>>, vector<8x128xf32>,
    return
  }
  func.func @transform_0(%arg0: i32) -> (i32, i32) {
    %c0_i32 = arith.constant 0 : i32
    %c0_i32_0 = arith.constant 0 : i32
    return %arg0, %c0_i32 : i32, i32
  }
  func.func @transform_1(%arg0: i32) -> (i32, i32) {
    %c0_i32 = arith.constant 0 : i32
    %c0_i32_0 = arith.constant 0 : i32
    %c0_i32_1 = arith.constant 0 : i32
    return %c0_i32, %c0_i32_0 : i32, i32
  }
  func.func @transform_2(%arg0: i32) -> (i32, i32) {
    %c0_i32 = arith.constant 0 : i32
    %c0_i32_0 = arith.constant 0 : i32
    %c0_i32_1 = arith.constant 0 : i32
    return %c0_i32, %c0_i32_0 : i32, i32
  }
  func.func @transform_3(%arg0: i32) -> (i32, i32) {
    %c0_i32 = arith.constant 0 : i32
    %c0_i32_0 = arith.constant 0 : i32
    %c0_i32_1 = arith.constant 0 : i32
    return %c0_i32, %c0_i32_0 : i32, i32
  }
  func.func @transform_4(%arg0: i32) -> (i32, i32) {
    %c0_i32 = arith.constant 0 : i32
    %c0_i32_0 = arith.constant 0 : i32
    %c0_i32_1 = arith.constant 0 : i32
    return %c0_i32, %c0_i32_0 : i32, i32
  }
  func.func @transform_5(%arg0: i32) -> (i32, i32) {
    %c0_i32 = arith.constant 0 : i32
    %c0_i32_0 = arith.constant 0 : i32
    %c0_i32_1 = arith.constant 0 : i32
    return %c0_i32, %c0_i32_0 : i32, i32
  }
  func.func @transform_6(%arg0: i32) -> (i32, i32) {
    %c0_i32 = arith.constant 0 : i32
    %c0_i32_0 = arith.constant 0 : i32
    return %arg0, %c0_i32 : i32, i32
  }
}

</mosaic_0001>

<bundles_post_ra>
// kernel: feed_forward_net.1
= control target key start
LH: loop header
LB: loop body
LE: loop exit
PB: predicated region body
PF: predicated region fallthrough
CT: control target
= control target key end

     0   :  { %11 = vsyncpa [#allocation3], 0  ;;  %s963_s0 = inlined_call_operand.vmem [shape: f32[8,128], index: 0, kind: input, shape index: {}]   ;;  %s964_s1 = inlined_call_operand.hbm [shape: f32[128,128], index: 1, kind: input, shape index: {}]   ;;  %s965_s2 = inlined_call_operand.hbm [shape: f32[128,128], index: 2, kind: input, shape index: {}]   ;;  %s966_s3 = inlined_call_operand.hbm [shape: f32[128,128], index: 3, kind: input, shape index: {}]   ;;  %s967_s4 = inlined_call_operand.hbm [shape: f32[128,128], index: 4, kind: input, shape index: {}]   ;;  %s968_s5 = inlined_call_operand.vmem [shape: f32[4,128], index: 5, kind: input, shape index: {}]   ;;  %s969_s6 = inlined_call_operand.hbm [shape: f32[8,128], index: 6, kind: output, shape index: {}]  }
   0x1   :  { %12 = vsyncpa [#allocation6], 0 }
   0x2   :  { %13 = vsyncpa [#allocation9], 0 }
   0x3   :  { %14 = vsyncpa [#allocation4], 0  ;;  %s802_s21 = smov [#allocation5]   ;;  %s803_s23 = smov [#allocation2]  }
   0x4   :  { %s34_s22 = sshll.u32 %s802_s21, 4  ;;  %s22_s24 = sshll.u32 %s803_s23, 4  ;;  %s35_s22 = int_to_ptr.vmem [resolvable:$true] %s34_s22  ;;  %s23_s24 = int_to_ptr.vmem [resolvable:$true] %s22_s24 }
   0x5   :  { %s702_s25 = scalar_lea.vmem %s35_s22, 2048  ;;  %p707_p1 = scmp.lt.s32.totalorder %s35_s22, %s35_s22 }
   0x6   :  { %p703_p0 = scmp.ne.s32.totalorder %s35_s22, %s702_s25  ;;  %p708_p2 = scmp.lt.s32.totalorder %s702_s25, %s702_s25 }
   0x8   :  { %p709_p3 = por %p708_p2, %p707_p1 }
   0xa   :  { %p710_p4 = pnand %p709_p3, %p703_p0 }
   0xc   :  { %713 = shalt.err (!%p710_p4)
}
   0xd   :  { %s804_s26 = smov 128   ;;  %s805_s27 = smov 8  }
   0xe   :  { %40 = dma.hbm_to_vmem [thread:$0]  %s965_s2, 2048, %s35_s22, [#allocation6], %s804_s26, %s804_s26, %s805_s27  }
   0xf   :  { %s722_s30 = scalar_lea.vmem %s23_s24, 2048  ;;  %p727_p6 = scmp.lt.s32.totalorder %s23_s24, %s23_s24 }
  0x10   :  { %p723_p5 = scmp.ne.s32.totalorder %s23_s24, %s722_s30  ;;  %p728_p7 = scmp.lt.s32.totalorder %s722_s30, %s722_s30 }
  0x12   :  { %p729_p8 = por %p728_p7, %p727_p6 }
  0x14   :  { %p730_p9 = pnand %p729_p8, %p723_p5 }
  0x16   :  { %733 = shalt.err (!%p730_p9)
}
  0x17   :  { %28 = dma.hbm_to_vmem [thread:$0]  %s964_s1, 2048, %s23_s24, [#allocation3], %s804_s26, %s804_s26, %s805_s27  }
  0x18   :  { %s806_s9 = smov [#allocation7]   ;;  %s807_s11 = smov [#allocation8]  }
  0x19   :  { %s46_s10 = sshll.u32 %s806_s9, 4  ;;  %s58_s12 = sshll.u32 %s807_s11, 4  ;;  %s47_s10 = int_to_ptr.vmem [resolvable:$true] %s46_s10  ;;  %s59_s12 = int_to_ptr.vmem [resolvable:$true] %s58_s12 }
  0x1a   :  { %s742_s2 = scalar_lea.vmem %s47_s10, 2048  ;;  %p747_p11 = scmp.lt.s32.totalorder %s47_s10, %s47_s10 }
  0x1b   :  { %p743_p10 = scmp.ne.s32.totalorder %s47_s10, %s742_s2  ;;  %p748_p12 = scmp.lt.s32.totalorder %s742_s2, %s742_s2 }
  0x1d   :  { %p749_p13 = por %p748_p12, %p747_p11 }
  0x1f   :  { %p750_p0 = pnand %p749_p13, %p743_p10 }
  0x21   :  { %753 = shalt.err (!%p750_p0)
}
  0x22   :  { %52 = dma.hbm_to_vmem [thread:$0]  %s966_s3, 2048, %s47_s10, [#allocation6], %s804_s26, %s804_s26, %s805_s27  }
  0x23   :  { %s762_s1 = scalar_lea.vmem %s59_s12, 2048  ;;  %p767_p2 = scmp.lt.s32.totalorder %s59_s12, %s59_s12 }
  0x24   :  { %p763_p1 = scmp.ne.s32.totalorder %s59_s12, %s762_s1  ;;  %p768_p3 = scmp.lt.s32.totalorder %s762_s1, %s762_s1 }
  0x26   :  { %p769_p4 = por %p768_p3, %p767_p2 }
  0x28   :  { %p770_p5 = pnand %p769_p4, %p763_p1 }
  0x2a   :  { %773 = shalt.err (!%p770_p5)
}
  0x2b   :  { %64 = dma.hbm_to_vmem [thread:$0]  %s967_s4, 2048, %s59_s12, [#allocation9], %s804_s26, %s804_s26, %s805_s27  }
  0x2c   :  { %794 = dma.done.wait [#allocation3], 2048  }
  0x2d   :  { %795 = vsyncadd [#allocation3], 4294965248 }
  0x2e   :  { %796 = dma.done.wait [#allocation6], 4096  }
  0x2f   :  { %797 = vsyncadd [#allocation6], 4294963200 }
  0x30   :  { %798 = dma.done.wait [#allocation9], 2048  }
  0x31   :  { %799 = vsyncadd [#allocation9], 4294965248  ;;  %v808_v0 = vmov 0.0   ;;  %vm809_vm0 = vmmov 0   ;;  %v96_v1 = vld [vmem:[#allocation2 + $0x78] sm:$0xff]  ;;  %v95_v2 = vld [vmem:[#allocation2 + $0x70] sm:$0xff]  ;;  %v97_v38 = vlaneseq }
  0x32   :  { %539 = vmatprep.subr.mxu0 %v808_v0  ;;  %571 = vmatprep.mubr.msk.f32.mxu0 %vm809_vm0, %v808_v0  ;;  %v94_v3 = vld [vmem:[#allocation2 + $0x68] sm:$0xff]  ;;  %v93_v4 = vld [vmem:[#allocation2 + $0x60] sm:$0xff]  ;;  %v190_v5 = vld [vmem:[#allocation5 + $0x78] sm:$0xff] }
  0x33   :  { %574 = vmatprep.subr.mxu1 %v808_v0  ;;  %606 = vmatprep.mubr.msk.f32.mxu1 %vm809_vm0, %v808_v0  ;;  %v92_v6 = vld [vmem:[#allocation2 + $0x58] sm:$0xff]  ;;  %v189_v7 = vld [vmem:[#allocation5 + $0x70] sm:$0xff]  ;;  %v188_v8 = vld [vmem:[#allocation5 + $0x68] sm:$0xff]  ;;  %v917_v39 = vshrl.u32 %v97_v38, 7 }
  0x34   :  { %540 = vmatpush3.msra.mxu0 %v96_v1  ;;  %575 = vmatpush3.msra.mxu1 %v190_v5  ;;  %v91_v9 = vld [vmem:[#allocation2 + $0x50] sm:$0xff]  ;;  %v187_v10 = vld [vmem:[#allocation5 + $0x60] sm:$0xff]  ;;  %v90_v11 = vld [vmem:[#allocation2 + $0x48] sm:$0xff] }
  0x35   :  { %541 = vmatprep.subr.mxu0 %v808_v0  ;;  %576 = vmatprep.subr.mxu1 %v808_v0  ;;  %v89_v12 = vld [vmem:[#allocation2 + $0x40] sm:$0xff]  ;;  %v88_v13 = vld [vmem:[#allocation2 + $0x38] sm:$0xff]  ;;  %v87_v14 = vld [vmem:[#allocation2 + $0x30] sm:$0xff]  ;;  %v99_v40 = vsub.s32 0, %v917_v39 }
  0x36   :  { %542 = vmatpush3.msra.mxu0 %v95_v2  ;;  %577 = vmatpush3.msra.mxu1 %v189_v7  ;;  %v86_v15 = vld [vmem:[#allocation2 + $0x28] sm:$0xff]  ;;  %v85_v16 = vld [vmem:[#allocation2 + $0x20] sm:$0xff]  ;;  %v84_v17 = vld [vmem:[#allocation2 + $0x18] sm:$0xff] }
  0x37   :  { %543 = vmatprep.subr.mxu0 %v808_v0  ;;  %578 = vmatprep.subr.mxu1 %v808_v0  ;;  %v83_v18 = vld [vmem:[#allocation2 + $0x10] sm:$0xff]  ;;  %v82_v19 = vld [vmem:[#allocation2 + $0x8] sm:$0xff]  ;;  %v81_v20 = vld [vmem:[#allocation2] sm:$0xff] }
  0x38   :  { %544 = vmatpush3.msra.mxu0 %v94_v3  ;;  %579 = vmatpush3.msra.mxu1 %v188_v8  ;;  %v79_v21 = vld [vmem:[%s963_s0] sm:$0xff]  ;;  %v186_v22 = vld [vmem:[#allocation5 + $0x58] sm:$0xff]  ;;  %v185_v23 = vld [vmem:[#allocation5 + $0x50] sm:$0xff]  ;;  %v193_v3 = vsub.s32 1, %v917_v39 }
  0x39   :  { %545 = vmatprep.subr.mxu0 %v808_v0  ;;  %580 = vmatprep.subr.mxu1 %v808_v0  ;;  %v184_v24 = vld [vmem:[#allocation5 + $0x48] sm:$0xff]  ;;  %v183_v25 = vld [vmem:[#allocation5 + $0x40] sm:$0xff]  ;;  %v182_v26 = vld [vmem:[#allocation5 + $0x38] sm:$0xff] }
  0x3a   :  { %546 = vmatpush3.msra.mxu0 %v93_v4  ;;  %581 = vmatpush3.msra.mxu1 %v187_v10  ;;  %v181_v27 = vld [vmem:[#allocation5 + $0x30] sm:$0xff]  ;;  %v180_v28 = vld [vmem:[#allocation5 + $0x28] sm:$0xff]  ;;  %v179_v29 = vld [vmem:[#allocation5 + $0x20] sm:$0xff] }
  0x3b   :  { %547 = vmatprep.subr.mxu0 %v808_v0  ;;  %582 = vmatprep.subr.mxu1 %v808_v0  ;;  %v178_v30 = vld [vmem:[#allocation5 + $0x18] sm:$0xff]  ;;  %v177_v31 = vld [vmem:[#allocation5 + $0x10] sm:$0xff]  ;;  %v176_v32 = vld [vmem:[#allocation5 + $0x8] sm:$0xff] }
  0x3c   :  { %548 = vmatpush3.msra.mxu0 %v92_v6  ;;  %583 = vmatpush3.msra.mxu1 %v186_v22  ;;  %v175_v33 = vld [vmem:[#allocation5] sm:$0xff]  ;;  %v284_v34 = vld [vmem:[#allocation7 + $0x78] sm:$0xff]  ;;  %v283_v35 = vld [vmem:[#allocation7 + $0x70] sm:$0xff] }
  0x3d   :  { %549 = vmatprep.subr.mxu0 %v808_v0  ;;  %584 = vmatprep.subr.mxu1 %v808_v0  ;;  %v282_v36 = vld [vmem:[#allocation7 + $0x68] sm:$0xff]  ;;  %v281_v37 = vld [vmem:[#allocation7 + $0x60] sm:$0xff]  ;;  %v280_v50 = vld [vmem:[#allocation7 + $0x58] sm:$0xff] }
  0x3e   :  { %550 = vmatpush3.msra.mxu0 %v91_v9  ;;  %585 = vmatpush3.msra.mxu1 %v185_v23  ;;  %v923_v41 = vld [vmem:[%s968_s5] sm:$0xf]  ;;  %v279_v51 = vld [vmem:[#allocation7 + $0x50] sm:$0xff]  ;;  %v278_v52 = vld [vmem:[#allocation7 + $0x48] sm:$0xff]  ;;  %s810_s5 = smov [#allocation10]  }
  0x3f   :  { %551 = vmatprep.subr.mxu0 %v808_v0  ;;  %586 = vmatprep.subr.mxu1 %v808_v0  ;;  %v100_v42 = vrot.slane %v923_v41, %v99_v40  ;;  %v277_v53 = vld [vmem:[#allocation7 + $0x40] sm:$0xff]  ;;  %v276_v54 = vld [vmem:[#allocation7 + $0x38] sm:$0xff]  ;;  %v275_v55 = vld [vmem:[#allocation7 + $0x30] sm:$0xff]  ;;  %v194_v4 = vrot.slane %v923_v41, %v193_v3  ;;  %s460_s18 = sshll.u32 %s810_s5, 4  ;;  %s461_s18 = int_to_ptr.vmem [resolvable:$true] %s460_s18 }
  0x40   :  { %552 = vmatpush3.msra.mxu0 %v90_v11  ;;  %587 = vmatpush3.msra.mxu1 %v184_v24  ;;  %v274_v56 = vld [vmem:[#allocation7 + $0x28] sm:$0xff]  ;;  %v273_v57 = vld [vmem:[#allocation7 + $0x20] sm:$0xff]  ;;  %v272_v58 = vld [vmem:[#allocation7 + $0x18] sm:$0xff]  ;;  %v287_v24 = vsub.s32 2, %v917_v39  ;;  %s774_s19 = scalar_lea.vmem %s461_s18, 128  ;;  %p779_p7 = scmp.lt.s32.totalorder %s461_s18, %s461_s18 }
  0x41   :  { %553 = vmatprep.subr.mxu0 %v808_v0  ;;  %588 = vmatprep.subr.mxu1 %v808_v0  ;;  %v271_v59 = vld [vmem:[#allocation7 + $0x10] sm:$0xff]  ;;  %v270_v60 = vld [vmem:[#allocation7 + $0x8] sm:$0xff]  ;;  %v269_v61 = vld [vmem:[#allocation7] sm:$0xff]  ;;  %p775_p6 = scmp.ne.s32.totalorder %s461_s18, %s774_s19  ;;  %p780_p8 = scmp.lt.s32.totalorder %s774_s19, %s774_s19 }
  0x42   :  { %554 = vmatpush3.msra.mxu0 %v89_v12  ;;  %589 = vmatpush3.msra.mxu1 %v183_v25  ;;  %v378_v62 = vld [vmem:[#allocation8 + $0x78] sm:$0xff]  ;;  %v377_v63 = vld [vmem:[#allocation8 + $0x70] sm:$0xff]  ;;  %v376_v1 = vld [vmem:[#allocation8 + $0x68] sm:$0xff]  ;;  %v288_v25 = vrot.slane %v923_v41, %v287_v24 }
  0x43   :  { %555 = vmatprep.subr.mxu0 %v808_v0  ;;  %590 = vmatprep.subr.mxu1 %v808_v0  ;;  %v375_v2 = vld [vmem:[#allocation8 + $0x60] sm:$0xff]  ;;  %v374_v12 = vld [vmem:[#allocation8 + $0x58] sm:$0xff]  ;;  %v364_v22 = vld [vmem:[#allocation8 + $0x8] sm:$0xff]  ;;  %p781_p9 = por %p780_p8, %p779_p7 }
  0x44   :  { %556 = vmatpush3.msra.mxu0 %v88_v13  ;;  %591 = vmatpush3.msra.mxu1 %v182_v26  ;;  %v373_v13 = vld [vmem:[#allocation8 + $0x50] sm:$0xff]  ;;  %v363_v23 = vld [vmem:[#allocation8] sm:$0xff] }
  0x45   :  { %557 = vmatprep.subr.mxu0 %v808_v0  ;;  %592 = vmatprep.subr.mxu1 %v808_v0  ;;  %p782_p10 = pnand %p781_p9, %p775_p6 }
  0x46   :  { %558 = vmatpush3.msra.mxu0 %v87_v14  ;;  %593 = vmatpush3.msra.mxu1 %v181_v27  ;;  %v372_v14 = vld [vmem:[#allocation8 + $0x48] sm:$0xff] }
  0x47   :  { %559 = vmatprep.subr.mxu0 %v808_v0  ;;  %594 = vmatprep.subr.mxu1 %v808_v0 }
  0x48   :  { %560 = vmatpush3.msra.mxu0 %v86_v15  ;;  %595 = vmatpush3.msra.mxu1 %v180_v28  ;;  %v371_v15 = vld [vmem:[#allocation8 + $0x40] sm:$0xff] }
  0x49   :  { %561 = vmatprep.subr.mxu0 %v808_v0  ;;  %596 = vmatprep.subr.mxu1 %v808_v0 }
  0x4a   :  { %562 = vmatpush3.msra.mxu0 %v85_v16  ;;  %597 = vmatpush3.msra.mxu1 %v179_v29  ;;  %v370_v16 = vld [vmem:[#allocation8 + $0x38] sm:$0xff] }
  0x4b   :  { %563 = vmatprep.subr.mxu0 %v808_v0  ;;  %598 = vmatprep.subr.mxu1 %v808_v0 }
  0x4c   :  { %564 = vmatpush3.msra.mxu0 %v84_v17  ;;  %599 = vmatpush3.msra.mxu1 %v178_v30  ;;  %v369_v17 = vld [vmem:[#allocation8 + $0x30] sm:$0xff] }
  0x4d   :  { %565 = vmatprep.subr.mxu0 %v808_v0  ;;  %600 = vmatprep.subr.mxu1 %v808_v0 }
  0x4e   :  { %566 = vmatpush3.msra.mxu0 %v83_v18  ;;  %601 = vmatpush3.msra.mxu1 %v177_v31  ;;  %v368_v18 = vld [vmem:[#allocation8 + $0x28] sm:$0xff] }
  0x4f   :  { %567 = vmatprep.subr.mxu0 %v808_v0  ;;  %602 = vmatprep.subr.mxu1 %v808_v0 }
  0x50   :  { %568 = vmatpush3.msra.mxu0 %v82_v19  ;;  %603 = vmatpush3.msra.mxu1 %v176_v32  ;;  %v367_v19 = vld [vmem:[#allocation8 + $0x20] sm:$0xff] }
  0x51   :  { %569 = vmatprep.subr.mxu0 %v808_v0  ;;  %604 = vmatprep.subr.mxu1 %v808_v0 }
  0x52   :  { %570 = vmatpush3.msra.mxu0 %v81_v20  ;;  %605 = vmatpush3.msra.mxu1 %v175_v33  ;;  %v366_v20 = vld [vmem:[#allocation8 + $0x18] sm:$0xff]  ;;  %v381_v33 = vsub.s32 3, %v917_v39 }
  0x53   :  { %572 = vmatmul.mubr.f32.vlgmr.msra.gmra.mxu0 %v79_v21  ;;  %609 = vmatprep.subr.mxu0 %v808_v0  ;;  %v365_v21 = vld [vmem:[#allocation8 + $0x10] sm:$0xff] }
  0x54   :  { %641 = vmatprep.mubr.msk.f32.mxu0 %vm809_vm0, %v808_v0  ;;  %644 = vmatprep.subr.mxu1 %v808_v0 }
  0x55   :  { %610 = vmatpush3.msra.mxu0 %v284_v34  ;;  %v382_v34 = vrot.slane %v923_v41, %v381_v33 }
  0x56   :  { %611 = vmatprep.subr.mxu0 %v808_v0 }
  0x57   :  { %612 = vmatpush3.msra.mxu0 %v283_v35 }
  0x58   :  { %613 = vmatprep.subr.mxu0 %v808_v0 }
  0x59   :  { %614 = vmatpush3.msra.mxu0 %v282_v36 }
  0x5a   :  { %615 = vmatprep.subr.mxu0 %v808_v0 }
  0x5b   :  { %616 = vmatpush3.msra.mxu0 %v281_v37 }
  0x5c   :  { %617 = vmatprep.subr.mxu0 %v808_v0 }
  0x5d   :  { %618 = vmatpush3.msra.mxu0 %v280_v50 }
  0x5e   :  { %619 = vmatprep.subr.mxu0 %v808_v0 }
  0x5f   :  { %620 = vmatpush3.msra.mxu0 %v279_v51 }
  0x60   :  { %621 = vmatprep.subr.mxu0 %v808_v0 }
  0x61   :  { %622 = vmatpush3.msra.mxu0 %v278_v52 }
  0x62   :  { %623 = vmatprep.subr.mxu0 %v808_v0 }
  0x63   :  { %624 = vmatpush3.msra.mxu0 %v277_v53 }
  0x64   :  { %625 = vmatprep.subr.mxu0 %v808_v0 }
  0x65   :  { %626 = vmatpush3.msra.mxu0 %v276_v54 }
  0x66   :  { %627 = vmatprep.subr.mxu0 %v808_v0 }
  0x67   :  { %628 = vmatpush3.msra.mxu0 %v275_v55 }
  0x68   :  { %629 = vmatprep.subr.mxu0 %v808_v0 }
  0x69   :  { %630 = vmatpush3.msra.mxu0 %v274_v56 }
  0x6a   :  { %631 = vmatprep.subr.mxu0 %v808_v0 }
  0x6b   :  { %632 = vmatpush3.msra.mxu0 %v273_v57 }
  0x6c   :  { %633 = vmatprep.subr.mxu0 %v808_v0 }
  0x6d   :  { %634 = vmatpush3.msra.mxu0 %v272_v58 }
  0x6e   :  { %635 = vmatprep.subr.mxu0 %v808_v0 }
  0x6f   :  { %636 = vmatpush3.msra.mxu0 %v271_v59 }
  0x70   :  { %637 = vmatprep.subr.mxu0 %v808_v0 }
  0x71   :  { %638 = vmatpush3.msra.mxu0 %v270_v60 }
  0x72   :  { %639 = vmatprep.subr.mxu0 %v808_v0 }
  0x73   :  { %640 = vmatpush3.msra.mxu0 %v269_v61 }
 0x113   :  { %v167_v43 = vpop.f32.mrf.mxu0 }
 0x114   :  { %v168_v44 = vadd.f32 %v167_v43, %v100_v42 }
 0x115   :  { %v573_v45 = vpop.f32.mrf.mxu0 }
 0x116   :  { %v171_v46 = vmul.f32 0.5, %v168_v44 }
 0x118   :  { %688 = vtanh.f32 %v171_v46 }
 0x125   :  { %v689_v47 = vpop.eup %688 }
 0x126   :  { %v173_v48 = vadd.f32 1.0, %v689_v47 }
 0x128   :  { %v174_v49 = vmul.f32 0.5, %v173_v48 }
 0x12a   :  { %607 = vmatmul.mubr.f32.vlgmr.msra.gmra.mxu1 %v174_v49 }
 0x12b   :  { %676 = vmatprep.mubr.msk.f32.mxu1 %vm809_vm0, %v808_v0  ;;  %645 = vmatpush3.msra.mxu1 %v378_v62 }
 0x12c   :  { %646 = vmatprep.subr.mxu1 %v808_v0 }
 0x12d   :  { %647 = vmatpush3.msra.mxu1 %v377_v63 }
 0x12e   :  { %648 = vmatprep.subr.mxu1 %v808_v0 }
 0x12f   :  { %649 = vmatpush3.msra.mxu1 %v376_v1 }
 0x130   :  { %650 = vmatprep.subr.mxu1 %v808_v0 }
 0x131   :  { %651 = vmatpush3.msra.mxu1 %v375_v2 }
 0x132   :  { %652 = vmatprep.subr.mxu1 %v808_v0 }
 0x133   :  { %653 = vmatpush3.msra.mxu1 %v374_v12 }
 0x134   :  { %654 = vmatprep.subr.mxu1 %v808_v0 }
 0x135   :  { %655 = vmatpush3.msra.mxu1 %v373_v13 }
 0x136   :  { %656 = vmatprep.subr.mxu1 %v808_v0 }
 0x137   :  { %657 = vmatpush3.msra.mxu1 %v372_v14 }
 0x138   :  { %658 = vmatprep.subr.mxu1 %v808_v0 }
 0x139   :  { %659 = vmatpush3.msra.mxu1 %v371_v15 }
 0x13a   :  { %660 = vmatprep.subr.mxu1 %v808_v0 }
 0x13b   :  { %661 = vmatpush3.msra.mxu1 %v370_v16 }
 0x13c   :  { %662 = vmatprep.subr.mxu1 %v808_v0 }
 0x13d   :  { %663 = vmatpush3.msra.mxu1 %v369_v17 }
 0x13e   :  { %664 = vmatprep.subr.mxu1 %v808_v0 }
 0x13f   :  { %665 = vmatpush3.msra.mxu1 %v368_v18 }
 0x140   :  { %666 = vmatprep.subr.mxu1 %v808_v0 }
 0x141   :  { %667 = vmatpush3.msra.mxu1 %v367_v19 }
 0x142   :  { %668 = vmatprep.subr.mxu1 %v808_v0 }
 0x143   :  { %669 = vmatpush3.msra.mxu1 %v366_v20 }
 0x144   :  { %670 = vmatprep.subr.mxu1 %v808_v0 }
 0x145   :  { %671 = vmatpush3.msra.mxu1 %v365_v21 }
 0x146   :  { %672 = vmatprep.subr.mxu1 %v808_v0 }
 0x147   :  { %673 = vmatpush3.msra.mxu1 %v364_v22 }
 0x148   :  { %674 = vmatprep.subr.mxu1 %v808_v0 }
 0x149   :  { %675 = vmatpush3.msra.mxu1 %v363_v23 }
 0x1ea   :  { %v261_v5 = vpop.f32.mrf.mxu1 }
 0x1eb   :  { %v262_v6 = vadd.f32 %v261_v5, %v194_v4 }
 0x1ec   :  { %v608_v7 = vpop.f32.mrf.mxu1 }
 0x1ed   :  { %v265_v8 = vmul.f32 0.5, %v262_v6 }
 0x1ef   :  { %690 = vtanh.f32 %v265_v8 }
 0x1fc   :  { %v691_v9 = vpop.eup %690 }
 0x1fd   :  { %v267_v10 = vadd.f32 1.0, %v691_v9 }
 0x1ff   :  { %v268_v11 = vmul.f32 0.5, %v267_v10 }
 0x201   :  { %642 = vmatmul.mubr.f32.vlgmr.msra.gmra.mxu0 %v268_v11 }
 0x2c1   :  { %v355_v26 = vpop.f32.mrf.mxu0 }
 0x2c2   :  { %v356_v27 = vadd.f32 %v355_v26, %v288_v25 }
 0x2c3   :  { %v643_v28 = vpop.f32.mrf.mxu0 }
 0x2c4   :  { %v359_v29 = vmul.f32 0.5, %v356_v27 }
 0x2c6   :  { %692 = vtanh.f32 %v359_v29 }
 0x2d3   :  { %v693_v30 = vpop.eup %692 }
 0x2d4   :  { %v361_v31 = vadd.f32 1.0, %v693_v30 }
 0x2d6   :  { %v362_v32 = vmul.f32 0.5, %v361_v31 }
 0x2d8   :  { %677 = vmatmul.mubr.f32.vlgmr.msra.gmra.mxu1 %v362_v32 }
 0x398   :  { %v449_v0 = vpop.f32.mrf.mxu1 }
 0x399   :  { %v450_v35 = vadd.f32 %v449_v0, %v382_v34 }
 0x39a   :  { %v678_v36 = vpop.f32.mrf.mxu1 }
 0x39b   :  { %453 = vst [vmem:[#allocation10] sm:$0xff] %v450_v35 }
 0x39c   :  { %785 = shalt.err (!%p782_p10)
}
 0x39d   :  { %463 = dma.vmem_to_hbm [thread:$0]  %s461_s18, 128, %s969_s6, [#allocation4]  }
 0x39e   :  { %800 = dma.done.wait [#allocation4], 128  }
 0x39f   :  { %801 = vsyncadd [#allocation4], 4294967168 }
 0x3a0   :  { %467 = vsyncpa [#allocation3], 1 }
 0x3a1   :  { %468 = vsyncpa [#allocation6], 1 }
 0x3a2   :  { %469 = vsyncpa [#allocation9], 1 }
 0x3a3   :  { %470 = vsyncpa [#allocation4], 1 }

</bundles_post_ra>
